<compile_context>
chip_gen: v7x
topology: tpu7x:2x2x1
jax: 0.10.0
libtpu: 0.0.40
codegen_flags: <defaults>
</compile_context>

<pallas_src>
import jax
import jax.numpy as jnp
from jax import lax
from jax.experimental import pallas as pl
from jax.experimental.pallas import tpu as pltpu


VMEM_LIMIT_BYTES = 48 * 1024 * 1024  # explicit scoped-VMEM cap (v5e/v6e/v7x safe)


def _tile(n, max_tile):
    """Largest power-of-two tile <= max_tile dividing n (falls back to n)."""
    t = max_tile
    while t > 8 and n % t != 0:
        t //= 2
    return t if n % t == 0 else n


def _const_spec(shape):
    """Constant-index block (weights/biases): single-buffered — double-buffering
    a block whose index never changes only doubles resident VMEM."""
    idx = lambda *args: (0,) * len(shape)
    try:
        return pl.BlockSpec(shape, idx, pipeline_mode=pl.Buffered(1))
    except (TypeError, AttributeError):   # older jax without pipeline_mode
        return pl.BlockSpec(shape, idx)


def prepare_params(params, compute_dtype=jnp.float32):
    """One-time parameter prep: fuse Wq|Wk|Wv and cast matmul operands."""
    (wq, wk, wv, wfc, ln1_g, ln1_b, ff1_w, ff1_b, ff2_w, ff2_b,
     ln2_g, ln2_b) = params
    cdt = compute_dtype
    wqkv = jnp.concatenate([wq, wk, wv], axis=1).astype(cdt)
    return (wqkv, wfc.astype(cdt), ln1_g, ln1_b,
            ff1_w.astype(cdt), ff1_b, ff2_w.astype(cdt), ff2_b, ln2_g, ln2_b)


def make_encoder_layer(d_model, d_k, d_v, n_heads, d_ff,
                       compute_dtype=jnp.float32, attn_dtype=jnp.float32):
    eps = 1e-5
    scale = 1.0 / float(d_k) ** 0.5
    Hdk = n_heads * d_k
    Hdv = n_heads * d_v
    w_qkv = 2 * Hdk + Hdv        # fused QKV projection width
    cdt = compute_dtype

    # ---------- stage 1: fused QKV projection over row tiles of B*L ----------
    def qkv_kernel(x_ref, wqkv_ref, qkv_ref):
        qkv_ref[...] = jnp.dot(
            x_ref[...], wqkv_ref[...],
            preferred_element_type=jnp.float32).astype(qkv_ref.dtype)

    # ---------- stage 2: attention core, one (batch, head, q-block) per step ----------
    def attn_kernel(q_ref, k_ref, v_ref, mask_ref, ctx_ref, attn_ref):
        q = q_ref[0, 0]                                    # [tq, dk]
        k = k_ref[0, 0]                                    # [L,  dk]
        v = v_ref[0, 0]                                    # [L,  dv]
        s = lax.dot_general(q, k, (((1,), (1,)), ((), ())),
                            preferred_element_type=jnp.float32) * scale
        # masked_fill semantics: replace masked scores with -1e9 (matches torch)
        s = jnp.where(mask_ref[0] > 0, jnp.float32(-1e9), s)
        s = s - jnp.max(s, axis=-1, keepdims=True)
        e = jnp.exp(s)
        a = e / jnp.sum(e, axis=-1, keepdims=True)         # exact normalization
        attn_ref[0, 0] = a.astype(attn_ref.dtype)
        ctx_ref[0, 0] = jnp.dot(a.astype(v.dtype), v,
                                preferred_element_type=jnp.float32
                                ).astype(ctx_ref.dtype)

    # ---------- stage 3: output projection + LN1 + FFN + LN2 over row tiles ----------
    def post_kernel(x_ref, ctx_ref, wfc_ref, ln1g_ref, ln1b_ref,
                    ff1w_ref, ff1b_ref, ff2w_ref, ff2b_ref,
                    ln2g_ref, ln2b_ref, out_ref):
        x = x_ref[...].astype(jnp.float32)                 # residual
        attn_out = jnp.dot(ctx_ref[...], wfc_ref[...],
                           preferred_element_type=jnp.float32)
        y = x + attn_out
        mu = jnp.mean(y, axis=-1, keepdims=True)
        var = jnp.mean((y - mu) ** 2, axis=-1, keepdims=True)
        y = (y - mu) * lax.rsqrt(var + eps) * ln1g_ref[...] + ln1b_ref[...]

        h = jnp.dot(y.astype(cdt), ff1w_ref[...],
                    preferred_element_type=jnp.float32) + ff1b_ref[...]
        h = jnp.maximum(h, 0.0)
        h = jnp.dot(h.astype(cdt), ff2w_ref[...],
                    preferred_element_type=jnp.float32) + ff2b_ref[...]
        z = y + h
        mu2 = jnp.mean(z, axis=-1, keepdims=True)
        var2 = jnp.mean((z - mu2) ** 2, axis=-1, keepdims=True)
        out_ref[...] = ((z - mu2) * lax.rsqrt(var2 + eps) * ln2g_ref[...]
                        + ln2b_ref[...]).astype(out_ref.dtype)

    def _cparams(sem):
        return pltpu.CompilerParams(dimension_semantics=sem,
                                    vmem_limit_bytes=VMEM_LIMIT_BYTES)

    def encoder_layer(x, mask, prepared):
        (wqkv, wfc, ln1_g, ln1_b, ff1_w, ff1_b, ff2_w, ff2_b,
         ln2_g, ln2_b) = prepared
        B, L, D = x.shape
        assert D == d_model
        BL = B * L
        rt = _tile(BL, 256)     # row tile for stages 1/3 (<=256 keeps v7x happy;
                                # raise max to 512 on v6e's 128 MiB VMEM)
        tq = _tile(L, 128)      # query tile for stage 2
        nq = L // tq

        x2d = x.reshape(BL, D)                              # free (row-major)
        x_mm = x2d.astype(cdt) if x2d.dtype != cdt else x2d

        row = lambda w: pl.BlockSpec((rt, w), lambda i: (i, 0))

        # -- stage 1: fused QKV projection --
        qkv2d = pl.pallas_call(
            qkv_kernel,
            grid=(BL // rt,),
            in_specs=[row(D), _const_spec((D, w_qkv))],
            out_specs=row(w_qkv),
            out_shape=jax.ShapeDtypeStruct((BL, w_qkv), cdt),
            compiler_params=_cparams(("parallel",)),
        )(x_mm, wqkv)

        # Head-major layout [B, H, L, d] so stage 2 indexes heads on a non-lane
        # axis (no sub-128 lane slicing / masked stores in the kernel).  These
        # XLA transposes are cheap relative to the [B,H,L,L] attention writeback.
        q = qkv2d[:, :Hdk].reshape(B, L, n_heads, d_k).transpose(0, 2, 1, 3)
        k = qkv2d[:, Hdk:2 * Hdk].reshape(B, L, n_heads, d_k).transpose(0, 2, 1, 3)
        v = qkv2d[:, 2 * Hdk:].reshape(B, L, n_heads, d_v).transpose(0, 2, 1, 3)

        # -- stage 2: attention, grid over (batch, head, query-block) --
        ctx, attn = pl.pallas_call(
            attn_kernel,
            grid=(B, n_heads, nq),
            in_specs=[
                pl.BlockSpec((1, 1, tq, d_k), lambda b, h, qi: (b, h, qi, 0)),
                pl.BlockSpec((1, 1, L, d_k), lambda b, h, qi: (b, h, 0, 0)),
                pl.BlockSpec((1, 1, L, d_v), lambda b, h, qi: (b, h, 0, 0)),
                pl.BlockSpec((1, tq, L), lambda b, h, qi: (b, qi, 0)),
            ],
            out_specs=[
                pl.BlockSpec((1, 1, tq, d_v), lambda b, h, qi: (b, h, qi, 0)),
                pl.BlockSpec((1, 1, tq, L), lambda b, h, qi: (b, h, qi, 0)),
            ],
            out_shape=[jax.ShapeDtypeStruct((B, n_heads, L, d_v), cdt),
                       jax.ShapeDtypeStruct((B, n_heads, L, L), attn_dtype)],
            compiler_params=_cparams(("parallel", "parallel", "parallel")),
        )(q, k, v, mask)

        # Back to token-major [BL, H*dv] for the single wide output projection.
        ctx2d = ctx.transpose(0, 2, 1, 3).reshape(BL, Hdv)

        # -- stage 3: output projection + LN1 + FFN + LN2 --
        out2d = pl.pallas_call(
            post_kernel,
            grid=(BL // rt,),
            in_specs=[row(D), row(Hdv),
                      _const_spec((Hdv, D)),
                      _const_spec((1, D)), _const_spec((1, D)),
                      _const_spec((D, d_ff)), _const_spec((1, d_ff)),
                      _const_spec((d_ff, D)), _const_spec((1, D)),
                      _const_spec((1, D)), _const_spec((1, D))],
            out_specs=row(D),
            out_shape=jax.ShapeDtypeStruct((BL, D), x.dtype),
            compiler_params=_cparams(("parallel",)),
        )(x2d, ctx2d, wfc, ln1_g, ln1_b, ff1_w, ff1_b, ff2_w, ff2_b,
          ln2_g, ln2_b)

        return out2d.reshape(B, L, D), attn

    return encoder_layer


def reference_encoder_layer(x, mask, params, d_k, d_v, n_heads, d_ff):
    """Pure-JAX reference matching the PyTorch forward semantics."""
    (wq, wk, wv, wfc, ln1_g, ln1_b, ff1_w, ff1_b, ff2_w, ff2_b,
     ln2_g, ln2_b) = params
    B, L, D = x.shape
    Q = (x @ wq).reshape(B, L, n_heads, d_k).transpose(0, 2, 1, 3)
    K = (x @ wk).reshape(B, L, n_heads, d_k).transpose(0, 2, 1, 3)
    V = (x @ wv).reshape(B, L, n_heads, d_v).transpose(0, 2, 1, 3)
    scores = jnp.einsum("bhqd,bhkd->bhqk", Q, K) / jnp.sqrt(jnp.float32(d_k))
    m = (mask[:, None, :, :] > 0)
    scores = jnp.where(m, -1e9, scores)           # masked_fill semantics
    attn = jax.nn.softmax(scores, axis=-1)
    prob = jnp.einsum("bhqk,bhkd->bhqd", attn, V)
    prob = prob.transpose(0, 2, 1, 3).reshape(B, L, n_heads * d_v)
    out = prob @ wfc

    def ln(v, g, b):
        mu = jnp.mean(v, -1, keepdims=True)
        var = jnp.mean((v - mu) ** 2, -1, keepdims=True)
        return (v - mu) / jnp.sqrt(var + 1e-5) * g + b

    y = ln(x + out, ln1_g[0], ln1_b[0])
    h = jnp.maximum(y @ ff1_w + ff1_b[0], 0.0)
    h = h @ ff2_w + ff2_b[0]
    z = ln(y + h, ln2_g[0], ln2_b[0])
    return z, attn


if __name__ == "__main__":
    B, L = 2, 8
    d_model, d_k, d_v, n_heads, d_ff = 32, 8, 8, 4, 64

    key = jax.random.PRNGKey(0)
    ks = jax.random.split(key, 10)
    x = jax.random.normal(ks[0], (B, L, d_model), jnp.float32)

    # pad mask: last 2 key positions masked (1 -> masked_fill with -1e9)
    mask = jnp.zeros((B, L, L), jnp.int32).at[:, :, L - 2:].set(1)

    s = 0.1
    params = (
        s * jax.random.normal(ks[1], (d_model, n_heads * d_k), jnp.float32),  # Wq
        s * jax.random.normal(ks[2], (d_model, n_heads * d_k), jnp.float32),  # Wk
        s * jax.random.normal(ks[3], (d_model, n_heads * d_v), jnp.float32),  # Wv
        s * jax.random.normal(ks[4], (n_heads * d_v, d_model), jnp.float32),  # Wfc
        jnp.ones((1, d_model), jnp.float32),                                   # ln1 gamma
        jnp.zeros((1, d_model), jnp.float32),                                  # ln1 beta
        s * jax.random.normal(ks[5], (d_model, d_ff), jnp.float32),            # ff1 w
        s * jax.random.normal(ks[6], (1, d_ff), jnp.float32),                  # ff1 b
        s * jax.random.normal(ks[7], (d_ff, d_model), jnp.float32),            # ff2 w
        s * jax.random.normal(ks[8], (1, d_model), jnp.float32),               # ff2 b
        jnp.ones((1, d_model), jnp.float32),                                   # ln2 gamma
        jnp.zeros((1, d_model), jnp.float32),                                  # ln2 beta
    )

    # f32 here so the check is tight; on v6e/v7x pass compute_dtype=jnp.bfloat16
    # (and attn_dtype=jnp.bfloat16 to halve the largest HBM writeback).
    encoder_layer = make_encoder_layer(d_model, d_k, d_v, n_heads, d_ff,
                                       compute_dtype=jnp.float32,
                                       attn_dtype=jnp.float32)
    prepared = prepare_params(params, jnp.float32)

    run = jax.jit(encoder_layer)
    out, attn = run(x, mask, prepared)
    jax.block_until_ready((out, attn))

    ref_out, ref_attn = reference_encoder_layer(x, mask, params,
                                                d_k, d_v, n_heads, d_ff)
    assert jnp.allclose(out, ref_out, atol=5e-3, rtol=1e-2), "output mismatch"
    assert jnp.allclose(attn, ref_attn, atol=5e-3, rtol=1e-2), "attn mismatch"
    print("KERNEL_OK")
</pallas_src>

<mosaic_0001>
module attributes {stable_mosaic.version = 11 : i64} {
  func.func @qkv_kernel(%arg0: i32, %arg1: memref<16x32xf32, #tpu.memory_space<vmem>>, %arg2: memref<32x96xf32, #tpu.memory_space<vmem>>, %arg3: memref<16x96xf32, #tpu.memory_space<vmem>>) attributes {dimension_semantics = [#tpu.dimension_semantics<parallel>], iteration_bounds = array<i64: 1>, scalar_prefetch = 0 : i64, scratch_operands = 0 : i64, tpu.core_type = #tpu.core_type<tc>, window_params = [{transform_indices = @transform_0, window_bounds = array<i64: 16, 32>}, {pipeline_mode = #tpu.pipeline_mode<synchronous>, transform_indices = @transform_1, window_bounds = array<i64: 32, 96>}, {transform_indices = @transform_2, window_bounds = array<i64: 16, 96>}]} {
    %c0 = arith.constant 0 : index
    %c0_0 = arith.constant 0 : index
    %0 = vector.load %arg1[%c0, %c0_0] : memref<16x32xf32, #tpu.memory_space<vmem>>, vector<16x32xf32>
    %c0_1 = arith.constant 0 : index
    %c0_2 = arith.constant 0 : index
    %1 = vector.load %arg2[%c0_1, %c0_2] : memref<32x96xf32, #tpu.memory_space<vmem>>, vector<32x96xf32>
    %cst = arith.constant dense<0.000000e+00> : vector<16x96xf32>
    %2 = tpu.matmul %0, %1, %cst {dimension_numbers = #tpu.dot_dimension_numbers<[1], [0], [0], [1], [0, 0, 1, 1], [], []>} : vector<16x32xf32>, vector<32x96xf32>, vector<16x96xf32> -> vector<16x96xf32>
    %c0_3 = arith.constant 0 : index
    %c0_4 = arith.constant 0 : index
    %3 = vector.load %arg3[%c0_3, %c0_4] : memref<16x96xf32, #tpu.memory_space<vmem>>, vector<16x96xf32>
    tpu.vector_store %arg3[%c0_3, %c0_4], %2 {strides = array<i32>} : memref<16x96xf32, #tpu.memory_space<vmem>>, vector<16x96xf32>,
    return
  }
  func.func @transform_0(%arg0: i32) -> (i32, i32) {
    %c0_i32 = arith.constant 0 : i32
    %c0_i32_0 = arith.constant 0 : i32
    return %arg0, %c0_i32 : i32, i32
  }
  func.func @transform_1(%arg0: i32) -> (i32, i32) {
    %c0_i32 = arith.constant 0 : i32
    %c0_i32_0 = arith.constant 0 : i32
    %c0_i32_1 = arith.constant 0 : i32
    return %c0_i32, %c0_i32_0 : i32, i32
  }
  func.func @transform_2(%arg0: i32) -> (i32, i32) {
    %c0_i32 = arith.constant 0 : i32
    %c0_i32_0 = arith.constant 0 : i32
    return %arg0, %c0_i32 : i32, i32
  }
}

module attributes {stable_mosaic.version = 11 : i64} {
  func.func @attn_kernel(%arg0: i32, %arg1: i32, %arg2: i32, %arg3: memref<1x1x8x8xf32, #tpu.memory_space<vmem>>, %arg4: memref<1x1x8x8xf32, #tpu.memory_space<vmem>>, %arg5: memref<1x1x8x8xf32, #tpu.memory_space<vmem>>, %arg6: memref<1x8x8xi32, #tpu.memory_space<vmem>>, %arg7: memref<1x1x8x8xf32, #tpu.memory_space<vmem>>, %arg8: memref<1x1x8x8xf32, #tpu.memory_space<vmem>>) attributes {dimension_semantics = [#tpu.dimension_semantics<parallel>, #tpu.dimension_semantics<parallel>, #tpu.dimension_semantics<parallel>], iteration_bounds = array<i64: 2, 4, 1>, scalar_prefetch = 0 : i64, scratch_operands = 0 : i64, tpu.core_type = #tpu.core_type<tc>, window_params = [{transform_indices = @transform_0, window_bounds = array<i64: 1, 1, 8, 8>}, {transform_indices = @transform_1, window_bounds = array<i64: 1, 1, 8, 8>}, {transform_indices = @transform_2, window_bounds = array<i64: 1, 1, 8, 8>}, {transform_indices = @transform_3, window_bounds = array<i64: 1, 8, 8>}, {transform_indices = @transform_4, window_bounds = array<i64: 1, 1, 8, 8>}, {transform_indices = @transform_5, window_bounds = array<i64: 1, 1, 8, 8>}]} {
    %c0 = arith.constant 0 : index
    %c0_0 = arith.constant 0 : index
    %c0_1 = arith.constant 0 : index
    %c0_2 = arith.constant 0 : index
    %0 = vector.load %arg3[%c0, %c0_0, %c0_1, %c0_2] : memref<1x1x8x8xf32, #tpu.memory_space<vmem>>, vector<1x1x8x8xf32>
    %1 = vector.shape_cast %0 : vector<1x1x8x8xf32> to vector<8x8xf32>
    %c0_3 = arith.constant 0 : index
    %c0_4 = arith.constant 0 : index
    %c0_5 = arith.constant 0 : index
    %c0_6 = arith.constant 0 : index
    %2 = vector.load %arg4[%c0_3, %c0_4, %c0_5, %c0_6] : memref<1x1x8x8xf32, #tpu.memory_space<vmem>>, vector<1x1x8x8xf32>
    %3 = vector.shape_cast %2 : vector<1x1x8x8xf32> to vector<8x8xf32>
    %c0_7 = arith.constant 0 : index
    %c0_8 = arith.constant 0 : index
    %c0_9 = arith.constant 0 : index
    %c0_10 = arith.constant 0 : index
    %4 = vector.load %arg5[%c0_7, %c0_8, %c0_9, %c0_10] : memref<1x1x8x8xf32, #tpu.memory_space<vmem>>, vector<1x1x8x8xf32>
    %5 = vector.shape_cast %4 : vector<1x1x8x8xf32> to vector<8x8xf32>
    %cst = arith.constant dense<0.000000e+00> : vector<8x8xf32>
    %6 = tpu.matmul %1, %3, %cst {dimension_numbers = #tpu.dot_dimension_numbers<[1], [1], [0], [0], [0, 0, 1, 0], [], []>} : vector<8x8xf32>, vector<8x8xf32>, vector<8x8xf32> -> vector<8x8xf32>
    %cst_11 = arith.constant 0.353553385 : f32
    %7 = vector.broadcast %cst_11 : f32 to vector<8x8xf32>
    %8 = arith.mulf %6, %7 : vector<8x8xf32>
    %c0_12 = arith.constant 0 : index
    %c0_13 = arith.constant 0 : index
    %c0_14 = arith.constant 0 : index
    %9 = vector.load %arg6[%c0_12, %c0_13, %c0_14] : memref<1x8x8xi32, #tpu.memory_space<vmem>>, vector<1x8x8xi32>
    %10 = vector.shape_cast %9 : vector<1x8x8xi32> to vector<8x8xi32>
    %c0_i32 = arith.constant 0 : i32
    %11 = vector.broadcast %c0_i32 : i32 to vector<8x8xi32>
    %12 = arith.cmpi sgt, %10, %11 : vector<8x8xi32>
    %cst_15 = arith.constant -1.000000e+09 : f32
    %13 = vector.broadcast %cst_15 : f32 to vector<8x8xf32>
    %14 = arith.select %12, %13, %8 : vector<8x8xi1>, vector<8x8xf32>
    %cst_16 = arith.constant dense<0xFF800000> : vector<8xf32>
    %15 = vector.multi_reduction <maximumf>, %14, %cst_16 [1] : vector<8x8xf32> to vector<8xf32>
    %16 = vector.shape_cast %15 : vector<8xf32> to vector<8x1xf32>
    %17 = vector.broadcast %16 : vector<8x1xf32> to vector<8x8xf32>
    %18 = arith.subf %14, %17 : vector<8x8xf32>
    %19 = math.exp %18 : vector<8x8xf32>
    %cst_17 = arith.constant dense<0.000000e+00> : vector<8xf32>
    %20 = vector.multi_reduction <add>, %19, %cst_17 [1] : vector<8x8xf32> to vector<8xf32>
    %21 = vector.shape_cast %20 : vector<8xf32> to vector<8x1xf32>
    %22 = vector.broadcast %21 : vector<8x1xf32> to vector<8x8xf32>
    %23 = arith.divf %19, %22 : vector<8x8xf32>
    %c0_18 = arith.constant 0 : index
    %c0_19 = arith.constant 0 : index
    %c0_20 = arith.constant 0 : index
    %c0_21 = arith.constant 0 : index
    %24 = vector.load %arg8[%c0_18, %c0_19, %c0_20, %c0_21] : memref<1x1x8x8xf32, #tpu.memory_space<vmem>>, vector<1x1x8x8xf32>
    %25 = vector.shape_cast %24 : vector<1x1x8x8xf32> to vector<8x8xf32>
    %26 = vector.shape_cast %23 : vector<8x8xf32> to vector<1x1x8x8xf32>
    tpu.vector_store %arg8[%c0_18, %c0_19, %c0_20, %c0_21], %26 {strides = array<i32>} : memref<1x1x8x8xf32, #tpu.memory_space<vmem>>, vector<1x1x8x8xf32>,
    %cst_22 = arith.constant dense<0.000000e+00> : vector<8x8xf32>
    %27 = tpu.matmul %23, %5, %cst_22 {dimension_numbers = #tpu.dot_dimension_numbers<[1], [0], [0], [1], [0, 0, 1, 1], [], []>} : vector<8x8xf32>, vector<8x8xf32>, vector<8x8xf32> -> vector<8x8xf32>
    %c0_23 = arith.constant 0 : index
    %c0_24 = arith.constant 0 : index
    %c0_25 = arith.constant 0 : index
    %c0_26 = arith.constant 0 : index
    %28 = vector.load %arg7[%c0_23, %c0_24, %c0_25, %c0_26] : memref<1x1x8x8xf32, #tpu.memory_space<vmem>>, vector<1x1x8x8xf32>
    %29 = vector.shape_cast %28 : vector<1x1x8x8xf32> to vector<8x8xf32>
    %30 = vector.shape_cast %27 : vector<8x8xf32> to vector<1x1x8x8xf32>
    tpu.vector_store %arg7[%c0_23, %c0_24, %c0_25, %c0_26], %30 {strides = array<i32>} : memref<1x1x8x8xf32, #tpu.memory_space<vmem>>, vector<1x1x8x8xf32>,
    return
  }
  func.func @transform_0(%arg0: i32, %arg1: i32, %arg2: i32) -> (i32, i32, i32, i32) {
    %c0_i32 = arith.constant 0 : i32
    %c0_i32_0 = arith.constant 0 : i32
    return %arg0, %arg1, %arg2, %c0_i32 : i32, i32, i32, i32
  }
  func.func @transform_1(%arg0: i32, %arg1: i32, %arg2: i32) -> (i32, i32, i32, i32) {
    %c0_i32 = arith.constant 0 : i32
    %c0_i32_0 = arith.constant 0 : i32
    %c0_i32_1 = arith.constant 0 : i32
    return %arg0, %arg1, %c0_i32, %c0_i32_0 : i32, i32, i32, i32
  }
  func.func @transform_2(%arg0: i32, %arg1: i32, %arg2: i32) -> (i32, i32, i32, i32) {
    %c0_i32 = arith.constant 0 : i32
    %c0_i32_0 = arith.constant 0 : i32
    %c0_i32_1 = arith.constant 0 : i32
    return %arg0, %arg1, %c0_i32, %c0_i32_0 : i32, i32, i32, i32
  }
  func.func @transform_3(%arg0: i32, %arg1: i32, %arg2: i32) -> (i32, i32, i32) {
    %c0_i32 = arith.constant 0 : i32
    %c0_i32_0 = arith.constant 0 : i32
    return %arg0, %arg2, %c0_i32 : i32, i32, i32
  }
  func.func @transform_4(%arg0: i32, %arg1: i32, %arg2: i32) -> (i32, i32, i32, i32) {
    %c0_i32 = arith.constant 0 : i32
    %c0_i32_0 = arith.constant 0 : i32
    return %arg0, %arg1, %arg2, %c0_i32 : i32, i32, i32, i32
  }
  func.func @transform_5(%arg0: i32, %arg1: i32, %arg2: i32) -> (i32, i32, i32, i32) {
    %c0_i32 = arith.constant 0 : i32
    %c0_i32_0 = arith.constant 0 : i32
    return %arg0, %arg1, %arg2, %c0_i32 : i32, i32, i32, i32
  }
}

module attributes {stable_mosaic.version = 11 : i64} {
  func.func @post_kernel(%arg0: i32, %arg1: memref<16x32xf32, #tpu.memory_space<vmem>>, %arg2: memref<16x32xf32, #tpu.memory_space<vmem>>, %arg3: memref<32x32xf32, #tpu.memory_space<vmem>>, %arg4: memref<1x32xf32, #tpu.memory_space<vmem>>, %arg5: memref<1x32xf32, #tpu.memory_space<vmem>>, %arg6: memref<32x64xf32, #tpu.memory_space<vmem>>, %arg7: memref<1x64xf32, #tpu.memory_space<vmem>>, %arg8: memref<64x32xf32, #tpu.memory_space<vmem>>, %arg9: memref<1x32xf32, #tpu.memory_space<vmem>>, %arg10: memref<1x32xf32, #tpu.memory_space<vmem>>, %arg11: memref<1x32xf32, #tpu.memory_space<vmem>>, %arg12: memref<16x32xf32, #tpu.memory_space<vmem>>) attributes {dimension_semantics = [#tpu.dimension_semantics<parallel>], iteration_bounds = array<i64: 1>, scalar_prefetch = 0 : i64, scratch_operands = 0 : i64, tpu.core_type = #tpu.core_type<tc>, window_params = [{transform_indices = @transform_0, window_bounds = array<i64: 16, 32>}, {transform_indices = @transform_1, window_bounds = array<i64: 16, 32>}, {pipeline_mode = #tpu.pipeline_mode<synchronous>, transform_indices = @transform_2, window_bounds = array<i64: 32, 32>}, {pipeline_mode = #tpu.pipeline_mode<synchronous>, transform_indices = @transform_3, window_bounds = array<i64: 1, 32>}, {pipeline_mode = #tpu.pipeline_mode<synchronous>, transform_indices = @transform_4, window_bounds = array<i64: 1, 32>}, {pipeline_mode = #tpu.pipeline_mode<synchronous>, transform_indices = @transform_5, window_bounds = array<i64: 32, 64>}, {pipeline_mode = #tpu.pipeline_mode<synchronous>, transform_indices = @transform_6, window_bounds = array<i64: 1, 64>}, {pipeline_mode = #tpu.pipeline_mode<synchronous>, transform_indices = @transform_7, window_bounds = array<i64: 64, 32>}, {pipeline_mode = #tpu.pipeline_mode<synchronous>, transform_indices = @transform_8, window_bounds = array<i64: 1, 32>}, {pipeline_mode = #tpu.pipeline_mode<synchronous>, transform_indices = @transform_9, window_bounds = array<i64: 1, 32>}, {pipeline_mode = #tpu.pipeline_mode<synchronous>, transform_indices = @transform_10, window_bounds = array<i64: 1, 32>}, {transform_indices = @transform_11, window_bounds = array<i64: 16, 32>}]} {
    %c0 = arith.constant 0 : index
    %c0_0 = arith.constant 0 : index
    %0 = vector.load %arg1[%c0, %c0_0] : memref<16x32xf32, #tpu.memory_space<vmem>>, vector<16x32xf32>
    %c0_1 = arith.constant 0 : index
    %c0_2 = arith.constant 0 : index
    %1 = vector.load %arg2[%c0_1, %c0_2] : memref<16x32xf32, #tpu.memory_space<vmem>>, vector<16x32xf32>
    %c0_3 = arith.constant 0 : index
    %c0_4 = arith.constant 0 : index
    %2 = vector.load %arg3[%c0_3, %c0_4] : memref<32x32xf32, #tpu.memory_space<vmem>>, vector<32x32xf32>
    %cst = arith.constant dense<0.000000e+00> : vector<16x32xf32>
    %3 = tpu.matmul %1, %2, %cst {dimension_numbers = #tpu.dot_dimension_numbers<[1], [0], [0], [1], [0, 0, 1, 1], [], []>} : vector<16x32xf32>, vector<32x32xf32>, vector<16x32xf32> -> vector<16x32xf32>
    %4 = arith.addf %0, %3 : vector<16x32xf32>
    %cst_5 = arith.constant dense<0.000000e+00> : vector<16xf32>
    %5 = vector.multi_reduction <add>, %4, %cst_5 [1] : vector<16x32xf32> to vector<16xf32>
    %6 = vector.shape_cast %5 : vector<16xf32> to vector<16x1xf32>
    %cst_6 = arith.constant 3.200000e+01 : f32
    %7 = vector.broadcast %cst_6 : f32 to vector<16x1xf32>
    %8 = arith.divf %6, %7 : vector<16x1xf32>
    %9 = vector.broadcast %8 : vector<16x1xf32> to vector<16x32xf32>
    %10 = arith.subf %4, %9 : vector<16x32xf32>
    %11 = arith.mulf %10, %10 : vector<16x32xf32>
    %cst_7 = arith.constant dense<0.000000e+00> : vector<16xf32>
    %12 = vector.multi_reduction <add>, %11, %cst_7 [1] : vector<16x32xf32> to vector<16xf32>
    %13 = vector.shape_cast %12 : vector<16xf32> to vector<16x1xf32>
    %cst_8 = arith.constant 3.200000e+01 : f32
    %14 = vector.broadcast %cst_8 : f32 to vector<16x1xf32>
    %15 = arith.divf %13, %14 : vector<16x1xf32>
    %16 = vector.broadcast %8 : vector<16x1xf32> to vector<16x32xf32>
    %17 = arith.subf %4, %16 : vector<16x32xf32>
    %cst_9 = arith.constant 9.99999974E-6 : f32
    %18 = vector.broadcast %cst_9 : f32 to vector<16x1xf32>
    %19 = arith.addf %15, %18 : vector<16x1xf32>
    %20 = math.rsqrt %19 : vector<16x1xf32>
    %21 = vector.broadcast %20 : vector<16x1xf32> to vector<16x32xf32>
    %22 = arith.mulf %17, %21 : vector<16x32xf32>
    %c0_10 = arith.constant 0 : index
    %c0_11 = arith.constant 0 : index
    %23 = vector.load %arg4[%c0_10, %c0_11] : memref<1x32xf32, #tpu.memory_space<vmem>>, vector<1x32xf32>
    %24 = vector.broadcast %23 : vector<1x32xf32> to vector<16x32xf32>
    %25 = arith.mulf %22, %24 : vector<16x32xf32>
    %c0_12 = arith.constant 0 : index
    %c0_13 = arith.constant 0 : index
    %26 = vector.load %arg5[%c0_12, %c0_13] : memref<1x32xf32, #tpu.memory_space<vmem>>, vector<1x32xf32>
    %27 = vector.broadcast %26 : vector<1x32xf32> to vector<16x32xf32>
    %28 = arith.addf %25, %27 : vector<16x32xf32>
    %c0_14 = arith.constant 0 : index
    %c0_15 = arith.constant 0 : index
    %29 = vector.load %arg6[%c0_14, %c0_15] : memref<32x64xf32, #tpu.memory_space<vmem>>, vector<32x64xf32>
    %cst_16 = arith.constant dense<0.000000e+00> : vector<16x64xf32>
    %30 = tpu.matmul %28, %29, %cst_16 {dimension_numbers = #tpu.dot_dimension_numbers<[1], [0], [0], [1], [0, 0, 1, 1], [], []>} : vector<16x32xf32>, vector<32x64xf32>, vector<16x64xf32> -> vector<16x64xf32>
    %c0_17 = arith.constant 0 : index
    %c0_18 = arith.constant 0 : index
    %31 = vector.load %arg7[%c0_17, %c0_18] : memref<1x64xf32, #tpu.memory_space<vmem>>, vector<1x64xf32>
    %32 = vector.broadcast %31 : vector<1x64xf32> to vector<16x64xf32>
    %33 = arith.addf %30, %32 : vector<16x64xf32>
    %cst_19 = arith.constant 0.000000e+00 : f32
    %34 = vector.broadcast %cst_19 : f32 to vector<16x64xf32>
    %35 = arith.maximumf %33, %34 : vector<16x64xf32>
    %c0_20 = arith.constant 0 : index
    %c0_21 = arith.constant 0 : index
    %36 = vector.load %arg8[%c0_20, %c0_21] : memref<64x32xf32, #tpu.memory_space<vmem>>, vector<64x32xf32>
    %cst_22 = arith.constant dense<0.000000e+00> : vector<16x32xf32>
    %37 = tpu.matmul %35, %36, %cst_22 {dimension_numbers = #tpu.dot_dimension_numbers<[1], [0], [0], [1], [0, 0, 1, 1], [], []>} : vector<16x64xf32>, vector<64x32xf32>, vector<16x32xf32> -> vector<16x32xf32>
    %c0_23 = arith.constant 0 : index
    %c0_24 = arith.constant 0 : index
    %38 = vector.load %arg9[%c0_23, %c0_24] : memref<1x32xf32, #tpu.memory_space<vmem>>, vector<1x32xf32>
    %39 = vector.broadcast %38 : vector<1x32xf32> to vector<16x32xf32>
    %40 = arith.addf %37, %39 : vector<16x32xf32>
    %41 = arith.addf %28, %40 : vector<16x32xf32>
    %cst_25 = arith.constant dense<0.000000e+00> : vector<16xf32>
    %42 = vector.multi_reduction <add>, %41, %cst_25 [1] : vector<16x32xf32> to vector<16xf32>
    %43 = vector.shape_cast %42 : vector<16xf32> to vector<16x1xf32>
    %cst_26 = arith.constant 3.200000e+01 : f32
    %44 = vector.broadcast %cst_26 : f32 to vector<16x1xf32>
    %45 = arith.divf %43, %44 : vector<16x1xf32>
    %46 = vector.broadcast %45 : vector<16x1xf32> to vector<16x32xf32>
    %47 = arith.subf %41, %46 : vector<16x32xf32>
    %48 = arith.mulf %47, %47 : vector<16x32xf32>
    %cst_27 = arith.constant dense<0.000000e+00> : vector<16xf32>
    %49 = vector.multi_reduction <add>, %48, %cst_27 [1] : vector<16x32xf32> to vector<16xf32>
    %50 = vector.shape_cast %49 : vector<16xf32> to vector<16x1xf32>
    %cst_28 = arith.constant 3.200000e+01 : f32
    %51 = vector.broadcast %cst_28 : f32 to vector<16x1xf32>
    %52 = arith.divf %50, %51 : vector<16x1xf32>
    %53 = vector.broadcast %45 : vector<16x1xf32> to vector<16x32xf32>
    %54 = arith.subf %41, %53 : vector<16x32xf32>
    %cst_29 = arith.constant 9.99999974E-6 : f32
    %55 = vector.broadcast %cst_29 : f32 to vector<16x1xf32>
    %56 = arith.addf %52, %55 : vector<16x1xf32>
    %57 = math.rsqrt %56 : vector<16x1xf32>
    %58 = vector.broadcast %57 : vector<16x1xf32> to vector<16x32xf32>
    %59 = arith.mulf %54, %58 : vector<16x32xf32>
    %c0_30 = arith.constant 0 : index
    %c0_31 = arith.constant 0 : index
    %60 = vector.load %arg10[%c0_30, %c0_31] : memref<1x32xf32, #tpu.memory_space<vmem>>, vector<1x32xf32>
    %61 = vector.broadcast %60 : vector<1x32xf32> to vector<16x32xf32>
    %62 = arith.mulf %59, %61 : vector<16x32xf32>
    %c0_32 = arith.constant 0 : index
    %c0_33 = arith.constant 0 : index
    %63 = vector.load %arg11[%c0_32, %c0_33] : memref<1x32xf32, #tpu.memory_space<vmem>>, vector<1x32xf32>
    %64 = vector.broadcast %63 : vector<1x32xf32> to vector<16x32xf32>
    %65 = arith.addf %62, %64 : vector<16x32xf32>
    %c0_34 = arith.constant 0 : index
    %c0_35 = arith.constant 0 : index
    %66 = vector.load %arg12[%c0_34, %c0_35] : memref<16x32xf32, #tpu.memory_space<vmem>>, vector<16x32xf32>
    tpu.vector_store %arg12[%c0_34, %c0_35], %65 {strides = array<i32>} : memref<16x32xf32, #tpu.memory_space<vmem>>, vector<16x32xf32>,
    return
  }
  func.func @transform_0(%arg0: i32) -> (i32, i32) {
    %c0_i32 = arith.constant 0 : i32
    %c0_i32_0 = arith.constant 0 : i32
    return %arg0, %c0_i32 : i32, i32
  }
  func.func @transform_1(%arg0: i32) -> (i32, i32) {
    %c0_i32 = arith.constant 0 : i32
    %c0_i32_0 = arith.constant 0 : i32
    return %arg0, %c0_i32 : i32, i32
  }
  func.func @transform_2(%arg0: i32) -> (i32, i32) {
    %c0_i32 = arith.constant 0 : i32
    %c0_i32_0 = arith.constant 0 : i32
    %c0_i32_1 = arith.constant 0 : i32
    return %c0_i32, %c0_i32_0 : i32, i32
  }
  func.func @transform_3(%arg0: i32) -> (i32, i32) {
    %c0_i32 = arith.constant 0 : i32
    %c0_i32_0 = arith.constant 0 : i32
    %c0_i32_1 = arith.constant 0 : i32
    return %c0_i32, %c0_i32_0 : i32, i32
  }
  func.func @transform_4(%arg0: i32) -> (i32, i32) {
    %c0_i32 = arith.constant 0 : i32
    %c0_i32_0 = arith.constant 0 : i32
    %c0_i32_1 = arith.constant 0 : i32
    return %c0_i32, %c0_i32_0 : i32, i32
  }
  func.func @transform_5(%arg0: i32) -> (i32, i32) {
    %c0_i32 = arith.constant 0 : i32
    %c0_i32_0 = arith.constant 0 : i32
    %c0_i32_1 = arith.constant 0 : i32
    return %c0_i32, %c0_i32_0 : i32, i32
  }
  func.func @transform_6(%arg0: i32) -> (i32, i32) {
    %c0_i32 = arith.constant 0 : i32
    %c0_i32_0 = arith.constant 0 : i32
    %c0_i32_1 = arith.constant 0 : i32
    return %c0_i32, %c0_i32_0 : i32, i32
  }
  func.func @transform_7(%arg0: i32) -> (i32, i32) {
    %c0_i32 = arith.constant 0 : i32
    %c0_i32_0 = arith.constant 0 : i32
    %c0_i32_1 = arith.constant 0 : i32
    return %c0_i32, %c0_i32_0 : i32, i32
  }
  func.func @transform_8(%arg0: i32) -> (i32, i32) {
    %c0_i32 = arith.constant 0 : i32
    %c0_i32_0 = arith.constant 0 : i32
    %c0_i32_1 = arith.constant 0 : i32
    return %c0_i32, %c0_i32_0 : i32, i32
  }
  func.func @transform_9(%arg0: i32) -> (i32, i32) {
    %c0_i32 = arith.constant 0 : i32
    %c0_i32_0 = arith.constant 0 : i32
    %c0_i32_1 = arith.constant 0 : i32
    return %c0_i32, %c0_i32_0 : i32, i32
  }
  func.func @transform_10(%arg0: i32) -> (i32, i32) {
    %c0_i32 = arith.constant 0 : i32
    %c0_i32_0 = arith.constant 0 : i32
    %c0_i32_1 = arith.constant 0 : i32
    return %c0_i32, %c0_i32_0 : i32, i32
  }
  func.func @transform_11(%arg0: i32) -> (i32, i32) {
    %c0_i32 = arith.constant 0 : i32
    %c0_i32_0 = arith.constant 0 : i32
    return %arg0, %c0_i32 : i32, i32
  }
}

</mosaic_0001>

<bundles_post_ra>
// kernel: encoder_layer.3
= control target key start
LH: loop header
LB: loop body
LE: loop exit
PB: predicated region body
PF: predicated region fallthrough
CT: control target
= control target key end

     0   :  { %7 = vsyncpa [#allocation3], 0  ;;  %s264_s0 = inlined_call_operand.hbm [shape: f32[16,32], index: 0, kind: input, shape index: {}]   ;;  %s265_s1 = inlined_call_operand.hbm [shape: f32[32,96], index: 1, kind: input, shape index: {}]   ;;  %s266_s2 = inlined_call_operand.vmem [shape: f32[16,96], index: 2, kind: output, shape index: {}]  }
   0x1   :  { %8 = vsyncpa [#allocation5], 0  ;;  %s215_s9 = smov [#allocation2]   ;;  %s167_s13 = scalar_lea.hbm %s264_s0, 256 }
   0x2   :  { %s14_s10 = sshll.u32 %s215_s9, 4  ;;  %p168_p0 = scmp.ne.s32.totalorder %s264_s0, %s167_s13  ;;  %s15_s10 = int_to_ptr.vmem [resolvable:$true] %s14_s10 }
   0x3   :  { %p171_p1 = scmp.lt.u32.totalorder %s167_s13, %s264_s0 }
   0x5   :  { %p173_p2 = pnand %p171_p1, %p168_p0 }
   0x7   :  { %176 = shalt.err (!%p173_p2)
}
   0x8   :  { %s177_s18 = scalar_lea.vmem %s15_s10, 256  ;;  %p182_p4 = scmp.lt.s32.totalorder %s15_s10, %s15_s10 }
   0x9   :  { %p178_p3 = scmp.ne.s32.totalorder %s15_s10, %s177_s18  ;;  %p183_p5 = scmp.lt.s32.totalorder %s177_s18, %s177_s18 }
   0xb   :  { %p184_p6 = por %p183_p5, %p182_p4 }
   0xd   :  { %p185_p7 = pnand %p184_p6, %p178_p3 }
   0xf   :  { %188 = shalt.err (!%p185_p7)
}
  0x10   :  { %s216_s19 = smov 128   ;;  %s217_s20 = smov 8  }
  0x11   :  { %20 = dma.hbm_to_vmem [thread:$0]  %s264_s0, 256, %s15_s10, [#allocation3], %s216_s19, %s216_s19, %s217_s20  }
  0x12   :  { %s218_s23 = smov [#allocation4]   ;;  %s189_s27 = scalar_lea.hbm %s265_s1, 512 }
  0x13   :  { %s26_s24 = sshll.u32 %s218_s23, 4  ;;  %p190_p8 = scmp.ne.s32.totalorder %s265_s1, %s189_s27  ;;  %s27_s24 = int_to_ptr.vmem [resolvable:$true] %s26_s24 }
  0x14   :  { %p193_p9 = scmp.lt.u32.totalorder %s189_s27, %s265_s1 }
  0x16   :  { %p195_p10 = pnand %p193_p9, %p190_p8 }
  0x18   :  { %198 = shalt.err (!%p195_p10)
}
  0x19   :  { %s199_s4 = scalar_lea.vmem %s27_s24, 512  ;;  %p204_p12 = scmp.lt.s32.totalorder %s27_s24, %s27_s24 }
  0x1a   :  { %p200_p11 = scmp.ne.s32.totalorder %s27_s24, %s199_s4  ;;  %p205_p13 = scmp.lt.s32.totalorder %s199_s4, %s199_s4 }
  0x1c   :  { %p206_p0 = por %p205_p13, %p204_p12 }
  0x1e   :  { %p207_p1 = pnand %p206_p0, %p200_p11 }
  0x20   :  { %210 = shalt.err (!%p207_p1)
}
  0x21   :  { %32 = dma.hbm_to_vmem [thread:$0]  %s265_s1, 512, %s27_s24, [#allocation5], %s216_s19, %s216_s19, %s217_s20  }
  0x22   :  { %211 = dma.done.wait [#allocation3], 256  }
  0x23   :  { %212 = vsyncadd [#allocation3], 4294967040 }
  0x24   :  { %213 = dma.done.wait [#allocation5], 512  }
  0x25   :  { %214 = vsyncadd [#allocation5], 4294966784  ;;  %vm45_vm0 = vcmask 261120   ;;  %v41_v0 = vld [vmem:[#allocation4] sm:$0xff]  ;;  %v42_v1 = vld [vmem:[#allocation4 + $0x8] sm:$0xff]  ;;  %vm127_vm1 = vcmask 785408  }
  0x26   :  { %v43_v2 = vld [vmem:[#allocation4 + $0x10] sm:$0xff]  ;;  %v155_v3 = vpack.c.bf16 %v42_v1, %v41_v0  ;;  %v44_v4 = vld [vmem:[#allocation4 + $0x18] sm:$0xff] }
  0x27   :  { %v39_v5 = vld [vmem:[#allocation2] sm:$0xff]  ;;  %v159_v6 = vpack.c.bf16 %v44_v4, %v43_v2  ;;  %v40_v7 = vld [vmem:[#allocation2 + $0x8] sm:$0xff] }
  0x28   :  { %152 = vmatprep.mubr.msk.f32.mxu0 %vm45_vm0, %v39_v5  ;;  %156 = vmatprep.subr.bf16.mxu0 %v155_v3 }
  0x29   :  { %158 = vmatpush3.bf16.msra.mxu0 %v155_v3 }
  0x2a   :  { %160 = vmatprep.subr.bf16.mxu0 %v159_v6 }
  0x2d   :  { %162 = vmatpush3.bf16.msra.mxu0 %v159_v6 }
  0x30   :  { %153 = vmatmul.mubr.msk.f32.vlgmr.msra.gmra.mrb[0].mxu0 %vm45_vm0, %v40_v7 }
 0x103   :  { %v154_v8 = vpop.f32.mrb[0].mxu0 }
 0x104   :  { %129 = vst.msk [vmem:[%s266_s2 + $0x8] sm:$0xff] %vm127_vm1, %v154_v8  ;;  %v118_v9 = vpop.f32.mrb[1].mxu0 }
 0x105   :  { %128 = vst.msk [vmem:[%s266_s2] sm:$0xff] %vm127_vm1, %v118_v9 }
 0x106   :  { %134 = vsyncpa [#allocation3], 1 }
 0x107   :  { %135 = vsyncpa [#allocation5], 1 }

// kernel: encoder_layer.4
= control target key start
LH: loop header
LB: loop body
LE: loop exit
PB: predicated region body
PF: predicated region fallthrough
CT: control target
= control target key end

     0   :  { %s1166_s0 = inlined_call_operand.vmem [shape: f32[2,4,8,8], index: 0, kind: input, shape index: {}]   ;;  %s1167_s1 = inlined_call_operand.vmem [shape: f32[2,4,8,8], index: 1, kind: input, shape index: {}]   ;;  %s1168_s2 = inlined_call_operand.vmem [shape: f32[2,4,8,8], index: 2, kind: input, shape index: {}]   ;;  %s1169_s3 = inlined_call_operand.vmem [shape: s32[2,8,8], index: 3, kind: input, shape index: {}]   ;;  %s1170_s4 = inlined_call_operand.vmem [shape: f32[2,4,8,8], index: 4, kind: output, shape index: {0}]   ;;  %s1171_s5 = inlined_call_operand.hbm [shape: f32[2,4,8,8], index: 5, kind: output, shape index: {1}]  }
   0x1   :  { %1172 = sst [smem:[#allocation5_spill]] %s1166_s0 }
   0x2   :  { %1173 = sst [smem:[#allocation6_spill]] %s1167_s1 }
   0x3   :  { %1174 = sst [smem:[#allocation7_spill]] %s1168_s2 }
   0x4   :  { %11 = vsyncpa [#allocation3], 0 }
   0x5   :  { %13 = vsyncpa [#allocation3 + $0x1], 0  ;;  %s1010_s18 = smov 0   ;;  %s1012_s19 = smov 0  }
   0x6   :  { %s1014_s20 = smov 0   ;;  %s1016_s21 = smov 0  }
   0x7   :  { %s1018_s22 = smov 0   ;;  %s1020_s23 = smov 0  }
   0x8   :  { %s1022_s24 = smov 0   ;;  %s1024_s25 = smov 0  }
   0x9 LB: > { %s767_s26 = sadd.s32 4294967295, %s975_s25   ;;  %s768_s27 = sadd.s32 4294967294, %s975_s25   ;;  %s975_s25 = sphi %s1024_s25, %s19_s25   ;;  %s971_s24 = sphi %s1022_s24, %s1186_s24   ;;  %s967_s23 = sphi %s1020_s23, %s1185_s23   ;;  %s963_s22 = sphi %s1018_s22, %s1184_s22   ;;  %s959_s21 = sphi %s1016_s21, %s1183_s21   ;;  %s955_s20 = sphi %s1014_s20, %s1182_s20   ;;  %s951_s19 = sphi %s1012_s19, %s1181_s19   ;;  %s947_s18 = sphi %s1010_s18, %s1180_s18  }
   0xa   : > { %s34_s28 = sadd.s32 1, %s967_s23  ;;  %s38_s29 = sadd.s32 1, %s971_s24 }
   0xb   : > { %p36_p0 = scmp.ge.s32.totalorder %s34_s28, 4  ;;  %p203_p1 = scmp.ne.s32.totalorder %s955_s20, %s951_s19 }
   0xc   : > { %p204_p2 = scmp.eq.s32.totalorder %s767_s26, 7  ;;  %p209_p5 = scmp.ne.s32.totalorder %s951_s19, %s947_s18 }
   0xd   : > { %s1188_s28 = smov (%p36_p0, %s34_s28), 0  ;;  %s1190_s29 = smov (!%p36_p0, %s38_s29), %s971_s24 }
   0xe   : > { %s187_s30 = ssub.s32 %s967_s23, %s1188_s28  ;;  %p1061_p3 = por %p204_p2, %p203_p1 }
   0xf   : > { %p40_p4 = scmp.ge.s32.totalorder %s1190_s29, 2  ;;  %p210_p6 = scmp.eq.s32.totalorder %s768_s27, 7 }
  0x10   : > { %p771_p7 = scmp.ge.s32.totalorder %s975_s25, 1  ;;  %p274_p9 = scmp.lt.s32.totalorder %s975_s25, 9 }
  0x11   : > { %s1192_s29 = smov (%p40_p4, %s1190_s29), 0  ;;  %p1070_p8 = por %p210_p6, %p209_p5 }
  0x12   : > { %s186_s8 = ssub.s32 %s971_s24, %s1192_s29  ;;  %s193_s9 = sadd.s32 1, %s955_s20 }
  0x13   : > { %s188_s10 = sor.u32 %s187_s30, %s186_s8  ;;  %p275_p10 = pnand %p771_p7, %p274_p9 }
  0x14   : > { %p191_p11 = scmp.eq.s32.totalorder %s188_s10, 0  ;;  %p342_p12 = scmp.lt.s32.totalorder (!%p275_p10), %s963_s22, 1  ;;  %v977_v0 = vmov (!%p275_p10), 0.0   ;;  %vm978_vm0 = vmmov (!%p275_p10), 0   ;;  %vm390_vm1 = vcmask (!%p275_p10), 64512  }
  0x15   : > { %278 = sbr.rel (%p275_p10) target bundleno = 780 (0x30c), region = 36  ;;  %p344_p13 = scmp.lt.s32.totalorder (!%p275_p10), %s959_s21, 3  ;;  %794 = vmatprep.subr.mxu0 (!%p275_p10), %v977_v0  ;;  %796 = vmatprep.mubr.msk.f32.mxu0 (!%p275_p10), %vm978_vm0, %v977_v0 }
  0x16   : > { %s1079_s11 = scalar_select %p191_p11, %s955_s20, %s193_s9  }
  0x17   : > { %799 = vmatprep.subr.mxu1 (!%p275_p10), %v977_v0  ;;  %801 = vmatprep.mubr.msk.f32.mxu1 (!%p275_p10), %vm978_vm0, %v977_v0  ;;  %s1177_s1 = sld [smem:[#allocation6_spill]] (!%p275_p10)  ;;  %s1178_s0 = sld [smem:[#allocation5_spill]] (!%p275_p10) }
  0x18   : > { %s1179_s2 = sld [smem:[#allocation7_spill]] (!%p275_p10) }
  0x1c   : > { %s343_s12 = scalar_select %p342_p12, %s963_s22, 1 }
  0x1d   : > { %s345_s13 = scalar_select %p344_p13, %s959_s21, 3 }
  0x1e   : > { %s773_s14 = sshll.u32 %s343_s12, 2  ;;  %s779_s10 = sshll.u32 %s343_s12, 3 }
  0x1f   : > { %s350_s15 = sadd.s32 %s773_s14, %s345_s13 }
  0x20   : > { %s1085_s16 = sshll.u32 %s350_s15, 3  ;;  %s375_s15 = scalar_lea.vmem %s1169_s3, %s779_s10 }
  0x21   : > { %s360_s27 = scalar_lea.vmem %s1177_s1, %s1085_s16  ;;  %s352_s9 = scalar_lea.vmem %s1178_s0, %s1085_s16  ;;  %v468_v3 = vld [vmem:[%s375_s15] sm:$0xff] }
  0x22   : > { %v388_v1 = vld [vmem:[%s360_s27] sm:$0xff]  ;;  %vm469_vm2 = vcmp.gt.s32.totalorder %v468_v3, 0  ;;  %s368_s26 = scalar_lea.vmem %s1179_s2, %s1085_s16  ;;  %s339_s27 = sand.u32 1, %s951_s19  }
  0x23   : > { %795 = vmatpush3.xpose.msk.msra.mxu0 %vm390_vm1, %v388_v1  ;;  %v387_v2 = vld [vmem:[%s352_s9] sm:$0xff]  ;;  %s772_s30 = sshll.u32 %s339_s27, 3  ;;  %s786_s9 = sshll.u32 %s963_s22, 2 }
  0x24   : > { %v389_v14 = vld [vmem:[%s368_s26] sm:$0xff]  ;;  %s341_s8 = scalar_lea.vmem [#allocation2], %s772_s30  ;;  %s584_s10 = sadd.s32 %s959_s21, %s786_s9 }
  0x25   : > { %800 = vmatpush3.msra.mxu1 %v389_v14  ;;  %s787_s13 = sshll.u32 %s584_s10, 7  ;;  %s588_s14 = sshll.u32 %s341_s8, 4  ;;  %s589_s14 = int_to_ptr.vmem [resolvable:$true] %s588_s14 }
  0x26   : > { %797 = vmatmul.mubr.msk.f32.vlgmr.msra.gmra.mrb[0].mxu0 %vm390_vm1, %v387_v2  ;;  %s1114_s17 = scalar_lea.hbm %s1171_s5, %s787_s13  ;;  %s569_s26 = scalar_lea.sflag [#allocation3], %s339_s27 }
  0x27   : > { %s881_s0 = scalar_lea.vmem %s589_s14, 128  ;;  %s979_s1 = smov [#allocation2]  }
  0x28   : > { %p882_p0 = scmp.ne.s32.totalorder %s589_s14, %s881_s0  ;;  %s885_s30 = sshll.u32 %s979_s1, 4  ;;  %s886_s30 = int_to_ptr.vmem [resolvable:$false] %s885_s30 }
  0x29   : > { %s887_s2 = scalar_lea.vmem %s886_s30, 256  ;;  %p888_p4 = scmp.lt.s32.totalorder %s589_s14, %s886_s30 }
  0x2a   : > { %p883_p1 = pnand %p882_p0, %p1061_p3  ;;  %p889_p5 = scmp.lt.s32.totalorder %s887_s2, %s881_s0 }
  0x2c   : > { %p884_p2 = pneg %p883_p1  ;;  %p890_p6 = por %p889_p5, %p888_p4 }
  0x2e   : > { %p891_p7 = pnand %p890_p6, %p884_p2 }
  0xf9   : > { %v463_v4 = vpop.f32.mrb[0].mxu0 }
  0xfa   : > { %v467_v5 = vmul.f32 0.35355338, %v463_v4  ;;  %v798_v6 = vpop.f32.mrb[1].mxu0 }
  0xfc   : > { %v470_v7 = vsel %vm469_vm2, -1e+09, %v467_v5 }
  0xfd   : > { %v471_v8 = vsel %vm390_vm1, %v470_v7, -inf }
  0xfe   : > { %472 = vmax.xlane.f32.xlu0 %v471_v8 }
 0x18b   : > { %v473_v9 = vpop.xlane.xlu0 %472 }
 0x18c   : > { %v474_v10 = vsub.f32 %v470_v7, %v473_v9 }
 0x18e   : > { %v475_v11 = vmul.f32 1.442695, %v474_v10 }
 0x190   : > { %877 = vpow2.f32 %v475_v11 }
 0x19a   : > { %v878_v12 = vpop.eup %877 }
 0x19b   : > { %v477_v13 = vsel %vm390_vm1, %v878_v12, 0.0 }
 0x19c   : > { %478 = vadd.xlane.f32.xlu0 %v477_v13 }
 0x229   : > { %v479_v15 = vpop.xlane.xlu0 %478 }
 0x22a   : > { %879 = vrcp.f32 %v479_v15 }
 0x234   : > { %v880_v16 = vpop.eup %879 }
 0x235   : > { %v481_v17 = vmul.f32 %v880_v16, %v878_v12 }
 0x237   : > { %802 = vmatmul.mubr.msk.f32.vlgmr.msra.gmra.mrb[0].mxu1 %vm390_vm1, %v481_v17  ;;  %482 = vst.msk [vmem:[%s341_s8] sm:$0xff] %vm390_vm1, %v481_v17 }
 0x238   : > { %894 = shalt.err (!%p891_p7)
}
 0x239   : > { %s895_s21 = scalar_lea.hbm %s1114_s17, 128  ;;  %s899_s1 = scalar_lea.hbm %s1171_s5, 1024 }
 0x23a   : > { %p896_p9 = scmp.ne.s32.totalorder %s1114_s17, %s895_s21  ;;  %p900_p12 = scmp.lt.u32.totalorder %s1114_s17, %s1171_s5 }
 0x23b   : > { %p901_p13 = scmp.lt.u32.totalorder %s899_s1, %s895_s21  ;;  %p903_p1 = scmp.lt.u32.totalorder %s895_s21, %s1114_s17 }
 0x23c   : > { %p897_p10 = pnand %p896_p9, %p1061_p3 }
 0x23d   : > { %p902_p0 = por %p901_p13, %p900_p12 }
 0x23e   : > { %p898_p11 = pneg %p897_p10 }
 0x23f   : > { %p904_p2 = por %p903_p1, %p902_p0 }
 0x241   : > { %p905_p4 = pnand %p904_p2, %p898_p11 }
 0x243   : > { %908 = shalt.err (!%p905_p4)
}
 0x244   : > { %804 = dma.vmem_to_hbm [thread:$0]  (%p1061_p3), %s589_s14, 128, %s1114_s17, %s569_s26  }
 0x245   : > { %s386_s10 = scalar_lea.vmem %s1170_s4, %s1085_s16 }
 0x30a   : > { %v552_v18 = vpop.f32.mrb[0].mxu1 }
 0x30b   : > { %556 = vst.msk [vmem:[%s386_s10] sm:$0xff] %vm390_vm1, %v552_v18  ;;  %v803_v19 = vpop.f32.mrb[1].mxu1 }
 0x30c PF: > { %p810_p5 = scmp.ge.s32.totalorder %s975_s25, 2  ;;  %s614_s13 = sand.u32 1, %s947_s18  }
 0x30d   : > { %s615_s6 = scalar_lea.sflag [#allocation3], %s614_s13 }
 0x30e   : > { %p807_p6 = pnand %p810_p5, %p1070_p8 }
 0x310   : > { %942 = dma.done.wait (!%p807_p6), %s615_s6, 128  }
 0x311   : > { %944 = vsyncadd (!%p807_p6), %s615_s6, 4294967168  ;;  %s19_s25 = sadd.s32 1, %s975_s25   ;;  %s1180_s18 = smov %s951_s19 }
 0x312   : > { %p16_p3 = scmp.ge.s32.totalorder %s19_s25, 10   ;;  %s1181_s19 = smov %s955_s20 }
 0x313   : > { %s1182_s20 = smov %s1079_s11  ;;  %s1183_s21 = smov %s967_s23 }
 0x314   : > { %s1184_s22 = smov %s971_s24  ;;  %s1185_s23 = smov %s1188_s28 }
 0x315   : > { %s1186_s24 = smov %s1192_s29  ;;  %18 = sbr.rel (!%p16_p3) target bundleno = 9 (0x9), region = 92 }
 0x31c   :  { %620 = vsyncpa [#allocation3], 1 }
 0x31d   :  { %622 = vsyncpa [#allocation3 + $0x1], 1 }

// kernel: encoder_layer.5
= control target key start
LH: loop header
LB: loop body
LE: loop exit
PB: predicated region body
PF: predicated region fallthrough
CT: control target
= control target key end

     0   :  { %vm47_vm0 = vcmask 261120   ;;  %s740_s0 = inlined_call_operand.vmem [shape: f32[16,32], index: 0, kind: input, shape index: {}]   ;;  %s741_s1 = inlined_call_operand.vmem [shape: f32[16,32], index: 1, kind: input, shape index: {}]   ;;  %s742_s2 = inlined_call_operand.vmem [shape: f32[32,32], index: 2, kind: input, shape index: {}]   ;;  %s743_s3 = inlined_call_operand.vmem [shape: f32[1,32], index: 3, kind: input, shape index: {}]   ;;  %s744_s4 = inlined_call_operand.vmem [shape: f32[1,32], index: 4, kind: input, shape index: {}]   ;;  %s745_s5 = inlined_call_operand.vmem [shape: f32[32,64], index: 5, kind: input, shape index: {}]   ;;  %s746_s6 = inlined_call_operand.vmem [shape: f32[1,64], index: 6, kind: input, shape index: {}]   ;;  %s747_s7 = inlined_call_operand.vmem [shape: f32[64,32], index: 7, kind: input, shape index: {}]   ;;  %s748_s8 = inlined_call_operand.vmem [shape: f32[1,32], index: 8, kind: input, shape index: {}]   ;;  %s749_s9 = inlined_call_operand.vmem [shape: f32[1,32], index: 9, kind: input, shape index: {}]   ;;  %s750_s10 = inlined_call_operand.vmem [shape: f32[1,32], index: 10, kind: input, shape index: {}]   ;;  %s751_s11 = inlined_call_operand.hbm [shape: f32[16,32], index: 11, kind: output, shape index: {}]  }
   0x1   :  { %v43_v0 = vld [vmem:[%s742_s2] sm:$0xff]  ;;  %v44_v1 = vld [vmem:[%s742_s2 + $0x8] sm:$0xff]  ;;  %v45_v2 = vld [vmem:[%s742_s2 + $0x10] sm:$0xff] }
   0x2   :  { %v506_v3 = vpack.c.bf16 %v44_v1, %v43_v0  ;;  %v46_v4 = vld [vmem:[%s742_s2 + $0x18] sm:$0xff]  ;;  %v41_v5 = vld [vmem:[%s741_s1] sm:$0xff] }
   0x3   :  { %v510_v6 = vpack.c.bf16 %v46_v4, %v45_v2  ;;  %473 = vmatprep.mubr.msk.f32.mxu1 %vm47_vm0, %v41_v5 }
   0x4   :  { %16 = vsyncpa [#allocation3], 0  ;;  %507 = vmatprep.subr.bf16.mxu1 %v506_v3  ;;  %v42_v7 = vld [vmem:[%s741_s1 + $0x8] sm:$0xff]  ;;  %v39_v8 = vld [vmem:[%s740_s0] sm:$0xff]  ;;  %vm285_vm1 = vcmask 523264   ;;  %s573_s19 = smov [#allocation2]  }
   0x5   :  { %509 = vmatpush3.bf16.msra.mxu1 %v506_v3  ;;  %v40_v10 = vld [vmem:[%s740_s0 + $0x8] sm:$0xff]  ;;  %v176_v26 = vld [vmem:[%s745_s5] sm:$0xff]  ;;  %v178_v29 = vld [vmem:[%s745_s5 + $0x10] sm:$0xff]  ;;  %s420_s20 = sshll.u32 %s573_s19, 4  ;;  %s421_s20 = int_to_ptr.vmem [resolvable:$true] %s420_s20 }
   0x6   :  { %511 = vmatprep.subr.bf16.mxu1 %v510_v6  ;;  %v177_v27 = vld [vmem:[%s745_s5 + $0x8] sm:$0xff]  ;;  %v179_v30 = vld [vmem:[%s745_s5 + $0x18] sm:$0xff]  ;;  %v270_v32 = vld [vmem:[%s747_s7] sm:$0xff]  ;;  %s549_s21 = scalar_lea.vmem %s421_s20, 256  ;;  %p554_p1 = scmp.lt.s32.totalorder %s421_s20, %s421_s20 }
   0x7   :  { %v514_v28 = vpack.c.bf16 %v177_v27, %v176_v26  ;;  %v518_v31 = vpack.c.bf16 %v179_v30, %v178_v29  ;;  %v271_v33 = vld [vmem:[%s747_s7 + $0x8] sm:$0xff]  ;;  %v272_v34 = vld [vmem:[%s747_s7 + $0x10] sm:$0xff]  ;;  %v273_v36 = vld [vmem:[%s747_s7 + $0x18] sm:$0xff]  ;;  %p550_p0 = scmp.ne.s32.totalorder %s421_s20, %s549_s21  ;;  %p555_p2 = scmp.lt.s32.totalorder %s549_s21, %s549_s21 }
   0x8   :  { %v522_v35 = vpack.c.bf16 %v271_v33, %v270_v32  ;;  %v526_v37 = vpack.c.bf16 %v273_v36, %v272_v34  ;;  %v274_v38 = vld [vmem:[%s747_s7 + $0x20] sm:$0xff]  ;;  %v275_v39 = vld [vmem:[%s747_s7 + $0x28] sm:$0xff]  ;;  %v276_v57 = vld [vmem:[%s747_s7 + $0x30] sm:$0xff] }
   0x9   :  { %513 = vmatpush3.bf16.msra.mxu1 %v510_v6  ;;  %v530_v40 = vpack.c.bf16 %v275_v39, %v274_v38  ;;  %v433_v48 = vld [vmem:[%s743_s3] ss:$0 sm:$0xff]  ;;  %v277_v58 = vld [vmem:[%s747_s7 + $0x38] sm:$0xff]  ;;  %p556_p3 = por %p555_p2, %p554_p1 }
   0xa   :  { %515 = vmatprep.subr.bf16.mxu1 %v514_v28  ;;  %523 = vmatprep.subr.bf16.mxu0 %v522_v35  ;;  %v434_v50 = vld [vmem:[%s744_s4] ss:$0 sm:$0xff]  ;;  %v534_v59 = vpack.c.bf16 %v277_v58, %v276_v57 }
   0xb   :  { %525 = vmatpush3.bf16.msra.mxu0 %v522_v35  ;;  %v435_v60 = vld [vmem:[%s746_s6] ss:$0 sm:$0xff]  ;;  %p557_p4 = pnand %p556_p3, %p550_p0 }
   0xc   :  { %474 = vmatmul.mubr.msk.f32.vlgmr.msra.gmra.mrb[0].mxu1 %vm47_vm0, %v42_v7  ;;  %527 = vmatprep.subr.bf16.mxu0 %v526_v37  ;;  %v438_v3 = vld [vmem:[%s748_s8] ss:$0 sm:$0xff] }
   0xd   :  { %517 = vmatpush3.bf16.msra.mxu1 %v514_v28  ;;  %v441_v29 = vld [vmem:[%s749_s9] ss:$0 sm:$0xff] }
   0xe   :  { %519 = vmatprep.subr.bf16.mxu1 %v518_v31  ;;  %v442_v33 = vld [vmem:[%s750_s10] ss:$0 sm:$0xff] }
   0xf   :  { %529 = vmatpush3.bf16.msra.mxu0 %v526_v37 }
  0x10   :  { %531 = vmatprep.subr.bf16.mxu0 %v530_v40 }
  0x11   :  { %521 = vmatpush3.bf16.msra.mxu1 %v518_v31 }
  0x13   :  { %533 = vmatpush3.bf16.msra.mxu0 %v530_v40 }
  0x14   :  { %535 = vmatprep.subr.bf16.mxu0 %v534_v59 }
  0x17   :  { %537 = vmatpush3.bf16.msra.mxu0 %v534_v59 }
  0xdf   :  { %v475_v9 = vpop.f32.mrb[0].mxu1 }
  0xe0   :  { %v120_v11 = vpop.f32.mrb[1].mxu1  ;;  %v130_v13 = vadd.f32 %v475_v9, %v40_v10 }
  0xe1   :  { %v129_v12 = vadd.f32 %v120_v11, %v39_v8 }
  0xe2   :  { %v134_v15 = vsel %vm47_vm0, %v130_v13, 0.0 }
  0xe3   :  { %v131_v14 = vsel %vm47_vm0, %v129_v12, 0.0 }
  0xe4   :  { %132 = vadd.xlane.f32.xlu0 %v131_v14 }
  0xe8   :  { %135 = vadd.xlane.f32.xlu0 %v134_v15 }
 0x171   :  { %v133_v16 = vpop.xlane.xlu0 %132 }
 0x172   :  { %v138_v17 = vmul.f32 0.03125, %v133_v16 }
 0x174   :  { %v140_v18 = vsub.f32 %v129_v12, %v138_v17 }
 0x175   :  { %v136_v19 = vpop.xlane.xlu0 %135 }
 0x176   :  { %v139_v20 = vmul.f32 0.03125, %v136_v19  ;;  %v142_v21 = vmul.f32 %v140_v18, %v140_v18 }
 0x178   :  { %v141_v22 = vsub.f32 %v130_v13, %v139_v20  ;;  %v144_v23 = vsel %vm47_vm0, %v142_v21, 0.0 }
 0x179   :  { %145 = vadd.xlane.f32.xlu1 %v144_v23 }
 0x17a   :  { %v143_v24 = vmul.f32 %v141_v22, %v141_v22 }
 0x17c   :  { %v147_v25 = vsel %vm47_vm0, %v143_v24, 0.0 }
 0x17d   :  { %148 = vadd.xlane.f32.xlu1 %v147_v25 }
 0x206   :  { %v146_v41 = vpop.xlane.xlu1 %145 }
 0x207   :  { %v150_v42 = vmul.f32 0.03125, %v146_v41 }
 0x209   :  { %v152_v43 = vadd.f32 1e-05, %v150_v42 }
 0x20a   :  { %v149_v44 = vpop.xlane.xlu1 %148 }
 0x20b   :  { %541 = vrsqrt.f32 %v152_v43  ;;  %v151_v45 = vmul.f32 0.03125, %v149_v44 }
 0x20d   :  { %v153_v46 = vadd.f32 1e-05, %v151_v45 }
 0x20f   :  { %543 = vrsqrt.f32 %v153_v46 }
 0x215   :  { %v542_v47 = vpop.eup %541 }
 0x216   :  { %v156_v49 = vmul.f32 %v542_v47, %v140_v18 }
 0x218   :  { %v165_v51 = vmul.f32 %v433_v48, %v156_v49 }
 0x219   :  { %v544_v52 = vpop.eup %543 }
 0x21a   :  { %v157_v53 = vmul.f32 %v544_v52, %v141_v22  ;;  %v174_v54 = vadd.f32 %v434_v50, %v165_v51 }
 0x21c   :  { %v166_v55 = vmul.f32 %v433_v48, %v157_v53  ;;  %484 = vmatprep.mubr.msk.f32.mxu1 %vm47_vm0, %v174_v54 }
 0x21e   :  { %v175_v56 = vadd.f32 %v434_v50, %v166_v55 }
 0x220   :  { %485 = vmatmul.mubr.msk.f32.vlgmr.msra.gmra.mrb[2].mxu1 %vm47_vm0, %v175_v56 }
 0x2f3   :  { %v486_v61 = vpop.f32.mrb[2].mxu1 }
 0x2f4   :  { %v265_v62 = vadd.f32 %v486_v61, %v435_v60  ;;  %v259_v63 = vpop.f32.mrb[3].mxu1 }
 0x2f5   :  { %v260_v0 = vadd.f32 %v435_v60, %v259_v63 }
 0x2f6   :  { %v269_v2 = vmax.f32 %v265_v62, 0.0 }
 0x2f7   :  { %v268_v1 = vmax.f32 %v260_v0, 0.0 }
 0x2f9   :  { %503 = vmatprep.mubr.msk.f32.mxu0 %vm285_vm1, %v268_v1 }
 0x2fa   :  { %504 = vmatmul.mubr.msk.f32.vlgmr.msra.gmra.mrb[0].mxu0 %vm285_vm1, %v269_v2 }
 0x3cd   :  { %v505_v4 = vpop.f32.mrb[0].mxu0 }
 0x3ce   :  { %v364_v5 = vadd.f32 %v505_v4, %v438_v3  ;;  %v358_v6 = vpop.f32.mrb[1].mxu0 }
 0x3cf   :  { %v359_v7 = vadd.f32 %v438_v3, %v358_v6 }
 0x3d0   :  { %v368_v8 = vadd.f32 %v364_v5, %v175_v56 }
 0x3d1   :  { %v367_v9 = vadd.f32 %v359_v7, %v174_v54 }
 0x3d2   :  { %v372_v10 = vsel %vm47_vm0, %v368_v8, 0.0 }
 0x3d3   :  { %373 = vadd.xlane.f32.xlu1 %v372_v10  ;;  %v369_v11 = vsel %vm47_vm0, %v367_v9, 0.0 }
 0x3d4   :  { %370 = vadd.xlane.f32.xlu0 %v369_v11 }
 0x460   :  { %v374_v12 = vpop.xlane.xlu1 %373 }
 0x461   :  { %v376_v13 = vmul.f32 0.03125, %v374_v12  ;;  %v371_v14 = vpop.xlane.xlu0 %370 }
 0x462   :  { %v375_v15 = vmul.f32 0.03125, %v371_v14 }
 0x463   :  { %v378_v16 = vsub.f32 %v368_v8, %v376_v13 }
 0x464   :  { %v377_v17 = vsub.f32 %v367_v9, %v375_v15 }
 0x465   :  { %v380_v18 = vmul.f32 %v378_v16, %v378_v16 }
 0x466   :  { %v379_v19 = vmul.f32 %v377_v17, %v377_v17 }
 0x467   :  { %v384_v20 = vsel %vm47_vm0, %v380_v18, 0.0 }
 0x468   :  { %385 = vadd.xlane.f32.xlu1 %v384_v20  ;;  %v381_v21 = vsel %vm47_vm0, %v379_v19, 0.0 }
 0x469   :  { %382 = vadd.xlane.f32.xlu0 %v381_v21 }
 0x4f5   :  { %v386_v22 = vpop.xlane.xlu1 %385 }
 0x4f6   :  { %v388_v23 = vmul.f32 0.03125, %v386_v22  ;;  %v383_v24 = vpop.xlane.xlu0 %382 }
 0x4f7   :  { %v387_v25 = vmul.f32 0.03125, %v383_v24 }
 0x4f8   :  { %v390_v26 = vadd.f32 1e-05, %v388_v23 }
 0x4f9   :  { %v389_v27 = vadd.f32 1e-05, %v387_v25 }
 0x4fa   :  { %545 = vrsqrt.f32 %v390_v26 }
 0x4fb   :  { %547 = vrsqrt.f32 %v389_v27 }
 0x504   :  { %v546_v28 = vpop.eup %545 }
 0x505   :  { %v548_v30 = vpop.eup %547  ;;  %v394_v31 = vmul.f32 %v546_v28, %v378_v16 }
 0x506   :  { %v393_v32 = vmul.f32 %v548_v30, %v377_v17 }
 0x507   :  { %v403_v34 = vmul.f32 %v441_v29, %v394_v31 }
 0x508   :  { %v402_v35 = vmul.f32 %v441_v29, %v393_v32 }
 0x509   :  { %v412_v36 = vadd.f32 %v442_v33, %v403_v34 }
 0x50a   :  { %v411_v37 = vadd.f32 %v442_v33, %v402_v35 }
 0x50b   :  { %414 = vst.msk [vmem:[#allocation2 + $0x8] sm:$0xff] %vm47_vm0, %v412_v36 }
 0x50c   :  { %413 = vst.msk [vmem:[#allocation2] sm:$0xff] %vm47_vm0, %v411_v37 }
 0x50d   :  { %560 = shalt.err (!%p557_p4)
}
 0x50e   :  { %s561_s22 = scalar_lea.hbm %s751_s11, 256 }
 0x50f   :  { %p562_p5 = scmp.ne.s32.totalorder %s751_s11, %s561_s22  ;;  %p565_p6 = scmp.lt.u32.totalorder %s561_s22, %s751_s11 }
 0x511   :  { %p567_p7 = pnand %p565_p6, %p562_p5 }
 0x513   :  { %570 = shalt.err (!%p567_p7)
}
 0x514   :  { %s574_s5 = smov 128   ;;  %s575_s27 = smov 8  }
 0x515   :  { %426 = dma.vmem_to_hbm [thread:$0]  %s421_s20, 256, %s751_s11, [#allocation3], %s574_s5, %s574_s5, %s575_s27  }
 0x516   :  { %571 = dma.done.wait [#allocation3], 256  }
 0x517   :  { %572 = vsyncadd [#allocation3], 4294967040 }
 0x518   :  { %430 = vsyncpa [#allocation3], 1 }

</bundles_post_ra>
